<compile_context>
chip_gen: v7x
topology: tpu7x:2x2x1
jax: 0.10.0
libtpu: 0.0.40
codegen_flags: <defaults>
</compile_context>

<pallas_src>
import functools

import jax
import jax.numpy as jnp
from jax import lax
from jax.experimental import pallas as pl
from jax.experimental.pallas import tpu as pltpu


# ---------------------------------------------------------------------------
# Helpers
# ---------------------------------------------------------------------------
def compute_same_pad(kernel_size, stride):
    """Mirror of glow's compute_same_pad."""
    if isinstance(kernel_size, int):
        kernel_size = (kernel_size, kernel_size)
    if isinstance(stride, int):
        stride = (stride, stride)
    return tuple(((k - 1) * s + 1) // 2 for k, s in zip(kernel_size, stride))


def _choose_hw_tile(hw, k9, itemsize, target_bytes=2 << 20):
    """Spatial tile for the flattened Hout*Wout axis.

    Full extent unless it is large and 128-divisible (the (8,128) BlockSpec
    rule requires either divisibility or the full dim)."""
    if hw % 128 != 0:
        return hw
    max_elems = target_bytes // max(1, k9 * itemsize)
    t = (max_elems // 128) * 128
    if t <= 0:
        t = 128
    t = max(128, min(t, hw))
    while hw % t != 0:
        t -= 128
    return t


# ---------------------------------------------------------------------------
# Kernel
# ---------------------------------------------------------------------------
def _conv2d_zeros_kernel(w_ref, b_ref, logs_ref, p_ref, o_ref, *, logscale_factor):
    # w_ref: (Cout, K9)   p_ref: (K9, hw_tile)   -> one MXU matmul, f32 acc.
    acc = jnp.dot(w_ref[...], p_ref[...], preferred_element_type=jnp.float32)
    acc = acc + b_ref[...].astype(jnp.float32)                  # (Cout,1) broadcast
    scale = jnp.exp(logs_ref[...].astype(jnp.float32) * logscale_factor)
    o_ref[...] = (acc * scale).astype(o_ref.dtype)


# ---------------------------------------------------------------------------
# Wrapper (mirrors Conv2dZeros.forward)
# ---------------------------------------------------------------------------
def conv2d_zeros(x, weight, bias, logs, *, stride=(1, 1), padding="same",
                 logscale_factor=3):
    """x: [B, Cin, H, W]; weight: [Cout, Cin, KH, KW]; bias: [Cout];
    logs: [Cout, 1, 1].  Returns [B, Cout, Hout, Wout]."""
    B, C_in, H, W = x.shape
    C_out, C_in_w, KH, KW = weight.shape
    assert C_in_w == C_in, "weight in_channels mismatch"
    sH, sW = (stride, stride) if isinstance(stride, int) else tuple(stride)

    if padding == "same":
        pH, pW = compute_same_pad((KH, KW), (sH, sW))
    elif padding == "valid":
        pH = pW = 0
    else:
        pH, pW = (padding, padding) if isinstance(padding, int) else tuple(padding)

    # Zero-pad (matches nn.Conv2d zero padding).
    xp = jnp.pad(x, ((0, 0), (0, 0), (pH, pH), (pW, pW)))
    Hp, Wp = H + 2 * pH, W + 2 * pW
    H_out = (Hp - KH) // sH + 1
    W_out = (Wp - KW) // sW + 1
    HW = H_out * W_out
    K9 = C_in * KH * KW

    # im2col: (B, Cin, KH*KW, Hout, Wout) -> (B, Cin*KH*KW, Hout*Wout).
    cols = []
    for dy in range(KH):
        for dx in range(KW):
            cols.append(lax.slice(
                xp,
                (0, 0, dy, dx),
                (B, C_in, dy + sH * (H_out - 1) + 1, dx + sW * (W_out - 1) + 1),
                (1, 1, sH, sW)))
    patches = jnp.stack(cols, axis=2).reshape(B, K9, HW)

    # Parameters for the kernel (weights in the activation dtype; params tiny).
    w_mat = weight.reshape(C_out, K9).astype(x.dtype)
    bias_col = bias.reshape(C_out, 1).astype(jnp.float32)
    logs_col = logs.reshape(C_out, 1).astype(jnp.float32)

    t_hw = _choose_hw_tile(HW, K9, jnp.dtype(x.dtype).itemsize)
    grid = (B, HW // t_hw)

    out_flat = pl.pallas_call(
        functools.partial(_conv2d_zeros_kernel,
                          logscale_factor=float(logscale_factor)),
        out_shape=jax.ShapeDtypeStruct((B, C_out, HW), x.dtype),
        grid=grid,
        in_specs=[
            pl.BlockSpec((C_out, K9), lambda b, s: (0, 0)),          # weights (resident)
            pl.BlockSpec((C_out, 1), lambda b, s: (0, 0)),           # bias
            pl.BlockSpec((C_out, 1), lambda b, s: (0, 0)),           # logs
            pl.BlockSpec((None, K9, t_hw), lambda b, s: (b, 0, s)),  # im2col patches
        ],
        out_specs=pl.BlockSpec((None, C_out, t_hw), lambda b, s: (b, 0, s)),
        compiler_params=pltpu.CompilerParams(
            dimension_semantics=("parallel", "parallel")),
    )(w_mat, bias_col, logs_col, patches)

    return out_flat.reshape(B, C_out, H_out, W_out)


# ---------------------------------------------------------------------------
# Pure-JAX reference (mirrors the PyTorch module exactly)
# ---------------------------------------------------------------------------
def _conv2d_zeros_ref(x, weight, bias, logs, logscale_factor,
                      stride=(1, 1), padding="same"):
    KH, KW = weight.shape[2], weight.shape[3]
    if padding == "same":
        pH, pW = compute_same_pad((KH, KW), stride)
    else:
        pH = pW = 0
    out = lax.conv_general_dilated(
        x, weight, window_strides=stride,
        padding=((pH, pH), (pW, pW)),
        dimension_numbers=("NCHW", "OIHW", "NCHW"),
        precision=lax.Precision.HIGHEST)
    out = out + bias[None, :, None, None]
    return out * jnp.exp(logs[None] * logscale_factor)


if __name__ == "__main__":
    import numpy as np

    key = jax.random.PRNGKey(0)
    kx, kw, kb, kl = jax.random.split(key, 4)

    B, C_in, H, W = 2, 4, 16, 16
    C_out, KH, KW = 8, 3, 3
    logscale_factor = 3

    x = jax.random.normal(kx, (B, C_in, H, W), dtype=jnp.float32)

    # Generic (post-training) parameters to exercise the full compute path.
    weight = 0.05 * jax.random.normal(kw, (C_out, C_in, KH, KW), jnp.float32)
    bias = 0.1 * jax.random.normal(kb, (C_out,), jnp.float32)
    logs = 0.1 * jax.random.normal(kl, (C_out, 1, 1), jnp.float32)

    y = conv2d_zeros(x, weight, bias, logs, logscale_factor=logscale_factor)
    y = jax.block_until_ready(y)
    assert y.shape == (B, C_out, H, W) and y.dtype == x.dtype

    y_ref = _conv2d_zeros_ref(x, weight, bias, logs, logscale_factor)
    np.testing.assert_allclose(np.asarray(y), np.asarray(y_ref),
                               rtol=1e-4, atol=1e-4)

    # Freshly constructed module: zero weights / bias / logs -> exactly zero output.
    z = conv2d_zeros(x, jnp.zeros_like(weight), jnp.zeros_like(bias),
                     jnp.zeros_like(logs), logscale_factor=logscale_factor)
    z = jax.block_until_ready(z)
    assert float(jnp.max(jnp.abs(z))) == 0.0

    print("KERNEL_OK")
</pallas_src>

<mosaic_0001>
module attributes {stable_mosaic.version = 11 : i64} {
  func.func @_conv2d_zeros_kernel(%arg0: i32, %arg1: i32, %arg2: memref<8x36xf32, #tpu.memory_space<vmem>>, %arg3: memref<8x1xf32, #tpu.memory_space<vmem>>, %arg4: memref<8x1xf32, #tpu.memory_space<vmem>>, %arg5: memref<1x36x256xf32, #tpu.memory_space<vmem>>, %arg6: memref<1x8x256xf32, #tpu.memory_space<vmem>>) attributes {dimension_semantics = [#tpu.dimension_semantics<parallel>, #tpu.dimension_semantics<parallel>], iteration_bounds = array<i64: 2, 1>, scalar_prefetch = 0 : i64, scratch_operands = 0 : i64, tpu.core_type = #tpu.core_type<tc>, window_params = [{pipeline_mode = #tpu.pipeline_mode<synchronous>, transform_indices = @transform_0, window_bounds = array<i64: 8, 36>}, {pipeline_mode = #tpu.pipeline_mode<synchronous>, transform_indices = @transform_1, window_bounds = array<i64: 8, 1>}, {pipeline_mode = #tpu.pipeline_mode<synchronous>, transform_indices = @transform_2, window_bounds = array<i64: 8, 1>}, {transform_indices = @transform_3, window_bounds = array<i64: 1, 36, 256>}, {transform_indices = @transform_4, window_bounds = array<i64: 1, 8, 256>}]} {
    %c0 = arith.constant 0 : index
    %c0_0 = arith.constant 0 : index
    %0 = vector.load %arg2[%c0, %c0_0] : memref<8x36xf32, #tpu.memory_space<vmem>>, vector<8x36xf32>
    %c0_1 = arith.constant 0 : index
    %c0_2 = arith.constant 0 : index
    %c0_3 = arith.constant 0 : index
    %1 = vector.load %arg5[%c0_1, %c0_2, %c0_3] : memref<1x36x256xf32, #tpu.memory_space<vmem>>, vector<1x36x256xf32>
    %2 = vector.shape_cast %1 : vector<1x36x256xf32> to vector<36x256xf32>
    %cst = arith.constant dense<0.000000e+00> : vector<8x256xf32>
    %3 = tpu.matmul %0, %2, %cst {dimension_numbers = #tpu.dot_dimension_numbers<[1], [0], [0], [1], [0, 0, 1, 1], [], []>} : vector<8x36xf32>, vector<36x256xf32>, vector<8x256xf32> -> vector<8x256xf32>
    %c0_4 = arith.constant 0 : index
    %c0_5 = arith.constant 0 : index
    %4 = vector.load %arg3[%c0_4, %c0_5] : memref<8x1xf32, #tpu.memory_space<vmem>>, vector<8x1xf32>
    %5 = vector.broadcast %4 : vector<8x1xf32> to vector<8x256xf32>
    %6 = arith.addf %3, %5 : vector<8x256xf32>
    %c0_6 = arith.constant 0 : index
    %c0_7 = arith.constant 0 : index
    %7 = vector.load %arg4[%c0_6, %c0_7] : memref<8x1xf32, #tpu.memory_space<vmem>>, vector<8x1xf32>
    %cst_8 = arith.constant 3.000000e+00 : f32
    %8 = vector.broadcast %cst_8 : f32 to vector<8x1xf32>
    %9 = arith.mulf %7, %8 : vector<8x1xf32>
    %10 = math.exp %9 : vector<8x1xf32>
    %11 = vector.broadcast %10 : vector<8x1xf32> to vector<8x256xf32>
    %12 = arith.mulf %6, %11 : vector<8x256xf32>
    %c0_9 = arith.constant 0 : index
    %c0_10 = arith.constant 0 : index
    %c0_11 = arith.constant 0 : index
    %13 = vector.load %arg6[%c0_9, %c0_10, %c0_11] : memref<1x8x256xf32, #tpu.memory_space<vmem>>, vector<1x8x256xf32>
    %14 = vector.shape_cast %13 : vector<1x8x256xf32> to vector<8x256xf32>
    %15 = vector.shape_cast %12 : vector<8x256xf32> to vector<1x8x256xf32>
    tpu.vector_store %arg6[%c0_9, %c0_10, %c0_11], %15 {strides = array<i32>} : memref<1x8x256xf32, #tpu.memory_space<vmem>>, vector<1x8x256xf32>,
    return
  }
  func.func @transform_0(%arg0: i32, %arg1: i32) -> (i32, i32) {
    %c0_i32 = arith.constant 0 : i32
    %c0_i32_0 = arith.constant 0 : i32
    %c0_i32_1 = arith.constant 0 : i32
    return %c0_i32, %c0_i32_0 : i32, i32
  }
  func.func @transform_1(%arg0: i32, %arg1: i32) -> (i32, i32) {
    %c0_i32 = arith.constant 0 : i32
    %c0_i32_0 = arith.constant 0 : i32
    %c0_i32_1 = arith.constant 0 : i32
    return %c0_i32, %c0_i32_0 : i32, i32
  }
  func.func @transform_2(%arg0: i32, %arg1: i32) -> (i32, i32) {
    %c0_i32 = arith.constant 0 : i32
    %c0_i32_0 = arith.constant 0 : i32
    %c0_i32_1 = arith.constant 0 : i32
    return %c0_i32, %c0_i32_0 : i32, i32
  }
  func.func @transform_3(%arg0: i32, %arg1: i32) -> (i32, i32, i32) {
    %c0_i32 = arith.constant 0 : i32
    %c0_i32_0 = arith.constant 0 : i32
    return %arg0, %c0_i32, %arg1 : i32, i32, i32
  }
  func.func @transform_4(%arg0: i32, %arg1: i32) -> (i32, i32, i32) {
    %c0_i32 = arith.constant 0 : i32
    %c0_i32_0 = arith.constant 0 : i32
    return %arg0, %c0_i32, %arg1 : i32, i32, i32
  }
}

</mosaic_0001>

<bundles_post_ra>
// kernel: tpu_custom_call.1
= control target key start
LH: loop header
LB: loop body
LE: loop exit
PB: predicated region body
PF: predicated region fallthrough
CT: control target
= control target key end

     0   :  { %9 = vsyncpa [#allocation3], 0  ;;  %s746_s0 = inlined_call_operand.vmem [shape: f32[8,36], index: 0, kind: input, shape index: {}]   ;;  %s747_s1 = inlined_call_operand.vmem [shape: f32[8,1], index: 1, kind: input, shape index: {}]   ;;  %s748_s2 = inlined_call_operand.vmem [shape: f32[8,1], index: 2, kind: input, shape index: {}]   ;;  %s749_s3 = inlined_call_operand.vmem [shape: f32[2,36,256], index: 3, kind: input, shape index: {}]   ;;  %s750_s4 = inlined_call_operand.hbm [shape: f32[2,8,256], index: 4, kind: output, shape index: {}]  }
   0x1   :  { %11 = vsyncpa [#allocation3 + $0x1], 0  ;;  %s625_s15 = smov 0   ;;  %s627_s16 = smov 0  }
   0x2   :  { %s629_s17 = smov 0   ;;  %s631_s18 = smov 0  }
   0x3   :  { %s633_s19 = smov 0   ;;  %s635_s20 = smov 0  }
   0x4 LB: > { %s432_s21 = sadd.s32 4294967295, %s595_s20   ;;  %s433_s22 = sadd.s32 4294967294, %s595_s20   ;;  %s595_s20 = sphi %s635_s20, %s17_s20   ;;  %s591_s19 = sphi %s633_s19, %s757_s19   ;;  %s587_s18 = sphi %s631_s18, %s756_s18   ;;  %s583_s17 = sphi %s629_s17, %s755_s17   ;;  %s579_s16 = sphi %s627_s16, %s754_s16   ;;  %s575_s15 = sphi %s625_s15, %s753_s15  }
   0x5   : > { %s29_s23 = sadd.s32 1, %s591_s19  ;;  %s129_s24 = sadd.s32 1, %s583_s17 }
   0x6   : > { %p31_p0 = scmp.ge.s32.totalorder %s29_s23, 2  ;;  %p139_p1 = scmp.ne.s32.totalorder %s583_s17, %s579_s16 }
   0x7   : > { %p140_p2 = scmp.eq.s32.totalorder %s432_s21, 1  ;;  %p145_p3 = scmp.ne.s32.totalorder %s579_s16, %s575_s15 }
   0x8   : > { %s759_s23 = smov (%p31_p0, %s29_s23), 0  ;;  %p146_p5 = scmp.eq.s32.totalorder %s433_s22, 1 }
   0x9   : > { %p665_p4 = por %p140_p2, %p139_p1  ;;  %s124_s26 = ssub.s32 %s591_s19, %s759_s23 }
   0xa   : > { %p436_p6 = scmp.ge.s32.totalorder %s595_s20, 1  ;;  %p127_p7 = scmp.eq.s32.totalorder %s124_s26, 0 }
   0xb   : > { %p672_p8 = por %p146_p5, %p145_p3  ;;  %p186_p9 = scmp.lt.s32.totalorder %s595_s20, 3 }
   0xc   : > { %s678_s28 = scalar_select %p127_p7, %s583_s17, %s129_s24  }
   0xd   : > { %p187_p10 = pnand %p436_p6, %p186_p9 }
   0xe   : > { %p217_p11 = scmp.lt.s32.totalorder (!%p187_p10), %s587_s18, 1  ;;  %v597_v0 = vmov (!%p187_p10), 0.0   ;;  %v598_v1 = vmov (!%p187_p10), 0   ;;  %v238_v2 = vld [vmem:[%s747_s1] sm:$0xff] (!%p187_p10)  ;;  %vm248_vm0 = vcmask (!%p187_p10), 1043456   ;;  %vm244_vm1 = vcmask (!%p187_p10), 293888  }
   0xf   : > { %190 = sbr.rel (%p187_p10) target bundleno = 271 (0x10f), region = 36  ;;  %319 = vmatprep.mubr.f32.mxu0 (!%p187_p10), %v597_v0  ;;  %514 = vset.pattern.permute.xlu0 (!%p187_p10), %v598_v1  ;;  %v326_v3 = vld [vmem:[%s748_s2] sm:$0xff] (!%p187_p10)  ;;  %s213_s14 = sand.u32 (!%p187_p10), 1, %s579_s16  }
  0x10   : > { %241 = vperm.xlu0 (!%p187_p10), %514, %v238_v2   ;;  %v327_v4 = vmul.f32 (!%p187_p10), 3.0, %v326_v3  ;;  %v227_v21 = vld [vmem:[%s746_s0] sm:$0xff] (!%p187_p10)  ;;  %s437_s21 = sshll.u32 (!%p187_p10), %s213_s14, 4  ;;  %s447_s22 = sshll.u32 (!%p187_p10), %s587_s18, 8 }
  0x11   : > { %s215_s24 = scalar_lea.vmem (!%p187_p10), [#allocation2], %s437_s21  ;;  %s699_s5 = scalar_lea.hbm (!%p187_p10), %s750_s4, %s447_s22 }
  0x12   : > { %v328_v5 = vmul.f32 (!%p187_p10), 1.442695, %v327_v4  ;;  %s356_s26 = sshll.u32 (!%p187_p10), %s215_s24, 4  ;;  %s340_s6 = scalar_lea.sflag (!%p187_p10), [#allocation3], %s213_s14  ;;  %s701_s26 = int_to_ptr.vmem [resolvable:$true] %s356_s26 }
  0x14   : > { %515 = vpow2.f32 (!%p187_p10), %v328_v5 }
  0x16   : > { %s218_s7 = scalar_select %p217_p11, %s587_s18, 1 }
  0x17   : > { %s517_s18 = scalar_lea.vmem %s701_s26, 256 }
  0x18   : > { %s456_s8 = smul.u32 80, %s218_s7  ;;  %p518_p12 = scmp.ne.s32.totalorder %s701_s26, %s517_s18 }
  0x19   : > { %s599_s7 = smov [#allocation2]  }
  0x1a   : > { %s224_s11 = scalar_lea.vmem %s749_s3, %s456_s8  ;;  %p519_p13 = pnand %p518_p12, %p665_p4 }
  0x1b   : > { %v229_v6 = vld [vmem:[%s224_s11 + $0x8] sm:$0xff]  ;;  %v231_v7 = vld [vmem:[%s224_s11 + $0x18] sm:$0xff]  ;;  %v228_v8 = vld [vmem:[%s224_s11] sm:$0xff]  ;;  %s521_s8 = sshll.u32 %s599_s7, 4  ;;  %s522_s8 = int_to_ptr.vmem [resolvable:$false] %s521_s8 }
  0x1c   : > { %v448_v9 = vpack.c.bf16 %v231_v7, %v229_v6  ;;  %v230_v10 = vld [vmem:[%s224_s11 + $0x10] sm:$0xff]  ;;  %v233_v11 = vld [vmem:[%s224_s11 + $0x28] sm:$0xff]  ;;  %v235_v12 = vld [vmem:[%s224_s11 + $0x38] sm:$0xff]  ;;  %p520_p0 = pneg %p519_p13  ;;  %s523_s9 = scalar_lea.vmem %s522_s8, 512 }
  0x1d   : > { %v450_v13 = vpack.c.bf16 %v230_v10, %v228_v8  ;;  %v452_v14 = vpack.c.bf16 %v235_v12, %v233_v11  ;;  %v232_v15 = vld [vmem:[%s224_s11 + $0x20] sm:$0xff]  ;;  %v234_v16 = vld [vmem:[%s224_s11 + $0x30] sm:$0xff]  ;;  %v237_v18 = vld [vmem:[%s224_s11 + $0x48] sm:$0xf]  ;;  %p524_p1 = scmp.lt.s32.totalorder %s701_s26, %s522_s8  ;;  %p525_p2 = scmp.lt.s32.totalorder %s523_s9, %s517_s18 }
  0x1e   : > { %449 = vmatprep.subr.bf16.mxu0 %v448_v9  ;;  %v454_v17 = vpack.c.bf16 %v234_v16, %v232_v15  ;;  %v516_v19 = vpop.eup %515  ;;  %v236_v20 = vld [vmem:[%s224_s11 + $0x40] sm:$0xf] }
  0x1f   : > { %451 = vmatpush1.bf16.msra.mxu0 %v450_v13  ;;  %332 = vperm.xlu0 %514, %v516_v19   ;;  %p526_p3 = por %p525_p2, %p524_p1 }
  0x20   : > { %453 = vmatprep.subr.bf16.mxu0 %v452_v14 }
  0x21   : > { %p527_p5 = pnand %p526_p3, %p520_p0 }
  0x23   : > { %455 = vmatpush1.bf16.msra.mxu0 %v454_v17 }
  0x24   : > { %439 = vmatprep.subr.msk.mxu0 %vm248_vm0, %v237_v18 }
  0x27   : > { %440 = vmatpush1.msk.msra.mxu0 %vm248_vm0, %v236_v20 }
  0x28   : > { %441 = vmatmul.mubr.msk.f32.vlgmr.msra.gmra.mrb[0].mxu0 %vm244_vm1, %v227_v21 }
  0x8f   : > { %v242_v22 = vpop.permute.xlu0 %241 }
  0x9e   : > { %v333_v26 = vpop.permute.xlu0 %332 }
  0xfb   : > { %v321_v23 = vpop.f32.mrb[0].mxu0 }
  0xfc   : > { %v322_v24 = vadd.f32 %v321_v23, %v242_v22  ;;  %v323_v25 = vpop.f32.mrb[1].mxu0 }
  0xfd   : > { %v324_v27 = vadd.f32 %v323_v25, %v242_v22 }
  0xfe   : > { %v335_v28 = vmul.f32 %v333_v26, %v322_v24 }
  0xff   : > { %v336_v29 = vmul.f32 %v333_v26, %v324_v27 }
 0x100   : > { %337 = vst [vmem:[%s215_s24] sm:$0xff] %v335_v28 }
 0x101   : > { %338 = vst [vmem:[%s215_s24 + $0x8] sm:$0xff] %v336_v29 }
 0x102   : > { %530 = shalt.err (!%p527_p5)
}
 0x103   : > { %s531_s10 = scalar_lea.hbm %s699_s5, 256  ;;  %s535_s13 = scalar_lea.hbm %s750_s4, 512 }
 0x104   : > { %p532_p6 = scmp.ne.s32.totalorder %s699_s5, %s531_s10  ;;  %p536_p10 = scmp.lt.u32.totalorder %s699_s5, %s750_s4 }
 0x105   : > { %p537_p11 = scmp.lt.u32.totalorder %s535_s13, %s531_s10  ;;  %p539_p13 = scmp.lt.u32.totalorder %s531_s10, %s699_s5 }
 0x106   : > { %p533_p7 = pnand %p532_p6, %p665_p4 }
 0x107   : > { %p538_p12 = por %p537_p11, %p536_p10 }
 0x108   : > { %p534_p9 = pneg %p533_p7 }
 0x109   : > { %p540_p0 = por %p539_p13, %p538_p12 }
 0x10b   : > { %p541_p1 = pnand %p540_p0, %p534_p9 }
 0x10d   : > { %544 = shalt.err (!%p541_p1)
}
 0x10e   : > { %457 = dma.vmem_to_hbm [thread:$0]  (%p665_p4), %s701_s26, 256, %s699_s5, %s340_s6  }
 0x10f PF: > { %p463_p2 = scmp.ge.s32.totalorder %s595_s20, 2  ;;  %s368_s22 = sand.u32 1, %s575_s15  }
 0x110   : > { %s369_s24 = scalar_lea.sflag [#allocation3], %s368_s22 }
 0x111   : > { %p460_p3 = pnand %p463_p2, %p672_p8 }
 0x113   : > { %570 = dma.done.wait (!%p460_p3), %s369_s24, 256  }
 0x114   : > { %572 = vsyncadd (!%p460_p3), %s369_s24, 4294967040  ;;  %s17_s20 = sadd.s32 1, %s595_s20   ;;  %s753_s15 = smov %s579_s16 }
 0x115   : > { %p14_p5 = scmp.ge.s32.totalorder %s17_s20, 4   ;;  %s754_s16 = smov %s583_s17 }
 0x116   : > { %s755_s17 = smov %s678_s28  ;;  %s756_s18 = smov %s591_s19 }
 0x117   : > { %s757_s19 = smov %s759_s23  ;;  %16 = sbr.rel (!%p14_p5) target bundleno = 4 (0x4), region = 71 }
 0x11e   :  { %374 = vsyncpa [#allocation3], 1 }
 0x11f   :  { %376 = vsyncpa [#allocation3 + $0x1], 1 }

</bundles_post_ra>
